<compile_context>
chip_gen: v7x
topology: tpu7x:2x2x1
jax: 0.10.0
libtpu: 0.0.40
codegen_flags: <defaults>
</compile_context>

<pallas_src>
import jax
import jax.numpy as jnp
from jax.experimental import pallas as pl
from jax.experimental.pallas import tpu as pltpu

INPUT_DIM = 32
NUM_LOSS_NET_LAYERS = 2
NUM_STEPS = 3                                  # args['test_iter']
OUTPUT_DIM = NUM_LOSS_NET_LAYERS * 2 * 2       # = 8
HALF_DIM = OUTPUT_DIM // 2                     # = 4
PAD = 128                                      # lane-dense padding for the MLP output
OFF_LANE = PAD // 2                            # offsets live at lanes [64, 64+HALF_DIM)
assert HALF_DIM <= OFF_LANE

# Row layout of the packed parameter slab (all blocks 8-row aligned where it matters).
R_W1 = 0                                       # rows [0, 32): w1, lanes [0, 32)
R_W2 = R_W1 + INPUT_DIM                        # rows [32, 160): w2big (rows>=32 zero)
R_B1 = R_W2 + PAD                              # row 160: b1 padded
R_B2 = R_B1 + 1                                # row 161: b2 padded (lanes 0:4 and 64:68)
R_MOBP = R_B2 + 1                              # row 162: multiplier/offset bias, disjoint lanes
R_ONES = R_MOBP + 1                            # row 163: 1.0 on lanes [0, HALF_DIM)
SLAB_ROWS = 168                                # multiple of 8


# ---------------------------------------------------------------------------
# Fused Pallas kernel: MLP + all loss-param updates in one invocation
# ---------------------------------------------------------------------------

def _fused_kernel(x_ref, slab_ref, *rest):
    """rest = (val_ref_0..val_ref_{n-1}, out_ref_0..out_ref_{n-1}); out_i aliases val_i."""
    n = len(rest) // 2
    val_refs = rest[:n]
    out_refs = rest[n:]

    w1 = slab_ref[R_W1:R_W1 + INPUT_DIM, :]      # (32, 128)  w1 in lanes [0,32)
    w2 = slab_ref[R_W2:R_W2 + PAD, :]            # (128, 128) w2 cols at lanes 0:4 and 64:68
    b1 = slab_ref[R_B1:R_B1 + 1, :]              # (1, 128)
    b2 = slab_ref[R_B2:R_B2 + 1, :]
    mobp = slab_ref[R_MOBP:R_MOBP + 1, :]
    ones_m = slab_ref[R_ONES:R_ONES + 1, :]

    # linear1 -> ReLU -> linear2 (lanes outside the valid range stay exactly zero).
    h = jnp.maximum(
        jnp.dot(x_ref[...], w1, preferred_element_type=jnp.float32) + b1, 0.0)   # (1,128)
    out = jnp.dot(h, w2, preferred_element_type=jnp.float32) + b2                # (1,128)
    # out[0, i]          = generated_multiplier[i]   for i < HALF_DIM
    # out[0, 64 + i]     = generated_offset[i]       for i < HALF_DIM

    # combined[0, i]      = 1 + multiplier_bias[i] * gm[i]
    # combined[0, 64 + i] =     offset_bias[i]     * go[i]
    combined = ones_m + mobp * out
    # Align the offset half onto lanes [0, HALF_DIM). Shift of exactly PAD//2 is
    # direction-independent, so one roll lets scale & offset share a single lane mask.
    off_aligned = pltpu.roll(combined, shift=OFF_LANE, axis=1)

    lane = jax.lax.broadcasted_iota(jnp.int32, (1, PAD), 1)
    for i in range(n):
        m = lane == i
        s11 = jnp.sum(jnp.where(m, combined, 0.0), axis=-1, keepdims=True)      # (1,1) scale_i
        o11 = jnp.sum(jnp.where(m, off_aligned, 0.0), axis=-1, keepdims=True)   # (1,1) offset_i
        out_refs[i][...] = s11 * val_refs[i][...] + o11


def _fused_forward(x, slab, vals2d):
    n = len(vals2d)
    vmem = pl.BlockSpec(memory_space=pltpu.MemorySpace.VMEM)
    out_shape = tuple(jax.ShapeDtypeStruct(v.shape, jnp.float32) for v in vals2d)
    return pl.pallas_call(
        _fused_kernel,
        out_shape=out_shape,
        in_specs=[vmem] * (2 + n),
        out_specs=tuple([vmem] * n),
        # In-place update of every loss param (out_i reuses val_i's buffer).
        input_output_aliases={2 + i: i for i in range(n)},
        compiler_params=pltpu.CompilerParams(vmem_limit_bytes=32 * 1024 * 1024),
    )(x, slab, *vals2d)


# ---------------------------------------------------------------------------
# jitted core (key filtering stays in Python so dict insertion order — the
# semantics of the PyTorch loop — is preserved)
# ---------------------------------------------------------------------------

def _to_lane_dense(v):
    """Return (2-D lane-dense f32 view, original shape, valid element count)."""
    shp, sz = v.shape, v.size
    v = v.astype(jnp.float32)
    if v.ndim >= 2 and v.shape[-1] % 128 == 0:
        return v.reshape(-1, v.shape[-1]), shp, sz
    flat = v.reshape(-1)
    padded = ((sz + 127) // 128) * 128
    if padded != sz:
        flat = jnp.pad(flat, (0, padded - sz))
    return flat.reshape(-1, 128), shp, sz


@jax.jit
def _forward_core(slab, task_state, vals):
    x = task_state.reshape(1, -1).astype(jnp.float32)
    vals2d, metas = [], []
    for v in vals:
        v2, shp, sz = _to_lane_dense(v)
        vals2d.append(v2)
        metas.append((shp, sz))
    outs2d = _fused_forward(x, slab, vals2d)
    return tuple(o.reshape(-1)[:sz].reshape(shp) for o, (shp, sz) in zip(outs2d, metas))


def loss_adapter_forward(step_params, task_state, num_step, loss_params):
    """LossAdapter.forward -> StepLossAdapter[num_step].forward."""
    tag = 'step{}'.format(num_step)
    matched = [(k, v) for k, v in loss_params.items() if tag in k]
    if not matched:
        return {}
    # PyTorch would raise an index error past multiplier_bias's length; be explicit.
    assert len(matched) <= HALF_DIM, (
        f"{len(matched)} loss params match '{tag}' but only {HALF_DIM} bias slots exist")
    keys = [k for k, _ in matched]
    vals = tuple(v for _, v in matched)
    slab = step_params[num_step]["slab"]
    outs = _forward_core(slab, task_state, vals)
    return dict(zip(keys, outs))


# ---------------------------------------------------------------------------
# Parameter init (deterministic, in-script)
# ---------------------------------------------------------------------------

def _build_slab(w1, b1, w2, b2, mult_bias, off_bias):
    """Pack all StepLossAdapter parameters into one lane/sublane-dense VMEM slab.

    NOTE: the slab is derived from the raw parameters; if these are ever trained,
    rebuild the slab after each update (staleness risk otherwise).
    """
    slab = jnp.zeros((SLAB_ROWS, PAD), jnp.float32)
    slab = slab.at[R_W1:R_W1 + INPUT_DIM, :INPUT_DIM].set(w1)
    slab = slab.at[R_W2:R_W2 + INPUT_DIM, :HALF_DIM].set(w2[:, :HALF_DIM])
    slab = slab.at[R_W2:R_W2 + INPUT_DIM, OFF_LANE:OFF_LANE + HALF_DIM].set(w2[:, HALF_DIM:])
    slab = slab.at[R_B1, :INPUT_DIM].set(b1)
    slab = slab.at[R_B2, :HALF_DIM].set(b2[:HALF_DIM])
    slab = slab.at[R_B2, OFF_LANE:OFF_LANE + HALF_DIM].set(b2[HALF_DIM:])
    slab = slab.at[R_MOBP, :HALF_DIM].set(mult_bias)
    slab = slab.at[R_MOBP, OFF_LANE:OFF_LANE + HALF_DIM].set(off_bias)
    slab = slab.at[R_ONES, :HALF_DIM].set(1.0)
    return slab


def init_loss_adapter_params(key):
    """One parameter set per step (LossAdapter holds num_steps StepLossAdapters)."""
    params = []
    for s in range(NUM_STEPS):
        k = jax.random.fold_in(key, s)
        k1, k2, k3, k4 = jax.random.split(k, 4)
        w1 = jax.random.normal(k1, (INPUT_DIM, INPUT_DIM), jnp.float32) / jnp.sqrt(INPUT_DIM)
        b1 = jax.random.normal(k2, (INPUT_DIM,), jnp.float32) * 0.01
        w2 = jax.random.normal(k3, (INPUT_DIM, OUTPUT_DIM), jnp.float32) / jnp.sqrt(INPUT_DIM)
        b2 = jax.random.normal(k4, (OUTPUT_DIM,), jnp.float32) * 0.01
        # PyTorch inits these two to zeros (which would make the update an exact identity);
        # use small deterministic nonzero values so the scale/offset path is exercised.
        mult_bias = jnp.linspace(0.1, 0.4, HALF_DIM, dtype=jnp.float32)
        off_bias = jnp.linspace(-0.2, 0.2, HALF_DIM, dtype=jnp.float32)
        slab = _build_slab(w1, b1, w2, b2, mult_bias, off_bias)
        params.append(dict(w1=w1, b1=b1, w2=w2, b2=b2,
                           multiplier_bias=mult_bias, offset_bias=off_bias,
                           slab=slab))
    return params


# ---------------------------------------------------------------------------
# Pure-JAX reference for verification
# ---------------------------------------------------------------------------

def reference_forward(step_params, task_state, num_step, loss_params):
    p = step_params[num_step]
    hp = jax.lax.Precision.HIGHEST
    x = task_state.astype(jnp.float32)
    h = jnp.maximum(jnp.dot(x, p["w1"], precision=hp) + p["b1"], 0.0)
    out = jnp.dot(h, p["w2"], precision=hp) + p["b2"]
    gm, go = out[:HALF_DIM], out[HALF_DIM:]
    i = 0
    res = {}
    for key, val in loss_params.items():
        if 'step{}'.format(num_step) in key:
            res[key] = (1.0 + p["multiplier_bias"][i] * gm[i]) * val \
                       + p["offset_bias"][i] * go[i]
            i += 1
    return res


if __name__ == "__main__":
    root = jax.random.PRNGKey(0)
    k_state, k_lp = jax.random.split(root)

    step_params = init_loss_adapter_params(root)
    task_state = jax.random.normal(k_state, (INPUT_DIM,), jnp.float32)

    num_step = 1
    # Exactly HALF_DIM (= num_loss_net_layers * 2) params match 'step1';
    # an extra non-matching key checks the filtering logic.  Shapes exercise the
    # lane-dense (rows,128), 1-D length-128, and ragged-needs-padding paths.
    lp_keys = [
        f"step{num_step}_layer0_weight",
        f"step{num_step}_layer0_bias",
        f"step{num_step}_layer1_weight",
        f"step{num_step}_layer1_bias",
        "step0_layer0_weight",
    ]
    lp_shapes = [(16, 128), (128,), (16, 128), (7, 33), (16, 128)]
    loss_params = {}
    for j, (k, shp) in enumerate(zip(lp_keys, lp_shapes)):
        loss_params[k] = jax.random.normal(jax.random.fold_in(k_lp, j), shp, jnp.float32)

    updated = loss_adapter_forward(step_params, task_state, num_step, loss_params)
    updated = jax.tree_util.tree_map(jax.block_until_ready, updated)

    ref = reference_forward(step_params, task_state, num_step, loss_params)
    assert set(updated.keys()) == set(ref.keys())
    for k in ref:
        assert updated[k].shape == ref[k].shape, k
        assert jnp.allclose(updated[k], ref[k], atol=2e-3, rtol=2e-3), k

    print("KERNEL_OK")
</pallas_src>

<mosaic_0001>
module attributes {stable_mosaic.version = 11 : i64} {
  func.func @_fused_kernel(%arg0: memref<1x32xf32, #tpu.memory_space<vmem>>, %arg1: memref<168x128xf32, #tpu.memory_space<vmem>>, %arg2: memref<16x128xf32, #tpu.memory_space<vmem>>, %arg3: memref<1x128xf32, #tpu.memory_space<vmem>>, %arg4: memref<16x128xf32, #tpu.memory_space<vmem>>, %arg5: memref<2x128xf32, #tpu.memory_space<vmem>>, %arg6: memref<16x128xf32, #tpu.memory_space<vmem>>, %arg7: memref<1x128xf32, #tpu.memory_space<vmem>>, %arg8: memref<16x128xf32, #tpu.memory_space<vmem>>, %arg9: memref<2x128xf32, #tpu.memory_space<vmem>>) attributes {dimension_semantics = [], scalar_prefetch = 0 : i64, scratch_operands = 0 : i64, tpu.core_type = #tpu.core_type<tc>} {
    %c0 = arith.constant 0 : index
    %c0_0 = arith.constant 0 : index
    %0 = vector.load %arg1[%c0, %c0_0] : memref<168x128xf32, #tpu.memory_space<vmem>>, vector<32x128xf32>
    %c32 = arith.constant 32 : index
    %c0_1 = arith.constant 0 : index
    %1 = vector.load %arg1[%c32, %c0_1] : memref<168x128xf32, #tpu.memory_space<vmem>>, vector<128x128xf32>
    %c160 = arith.constant 160 : index
    %c0_2 = arith.constant 0 : index
    %2 = vector.load %arg1[%c160, %c0_2] : memref<168x128xf32, #tpu.memory_space<vmem>>, vector<1x128xf32>
    %c161 = arith.constant 161 : index
    %c0_3 = arith.constant 0 : index
    %3 = vector.load %arg1[%c161, %c0_3] : memref<168x128xf32, #tpu.memory_space<vmem>>, vector<1x128xf32>
    %c162 = arith.constant 162 : index
    %c0_4 = arith.constant 0 : index
    %4 = vector.load %arg1[%c162, %c0_4] : memref<168x128xf32, #tpu.memory_space<vmem>>, vector<1x128xf32>
    %c163 = arith.constant 163 : index
    %c0_5 = arith.constant 0 : index
    %5 = vector.load %arg1[%c163, %c0_5] : memref<168x128xf32, #tpu.memory_space<vmem>>, vector<1x128xf32>
    %c0_6 = arith.constant 0 : index
    %c0_7 = arith.constant 0 : index
    %6 = vector.load %arg0[%c0_6, %c0_7] : memref<1x32xf32, #tpu.memory_space<vmem>>, vector<1x32xf32>
    %cst = arith.constant dense<0.000000e+00> : vector<1x128xf32>
    %7 = tpu.matmul %6, %0, %cst {dimension_numbers = #tpu.dot_dimension_numbers<[1], [0], [0], [1], [0, 0, 1, 1], [], []>} : vector<1x32xf32>, vector<32x128xf32>, vector<1x128xf32> -> vector<1x128xf32>
    %8 = arith.addf %7, %2 : vector<1x128xf32>
    %cst_8 = arith.constant 0.000000e+00 : f32
    %9 = vector.broadcast %cst_8 : f32 to vector<1x128xf32>
    %10 = arith.maximumf %8, %9 : vector<1x128xf32>
    %cst_9 = arith.constant dense<0.000000e+00> : vector<1x128xf32>
    %11 = tpu.matmul %10, %1, %cst_9 {dimension_numbers = #tpu.dot_dimension_numbers<[1], [0], [0], [1], [0, 0, 1, 1], [], []>} : vector<1x128xf32>, vector<128x128xf32>, vector<1x128xf32> -> vector<1x128xf32>
    %12 = arith.addf %11, %3 : vector<1x128xf32>
    %13 = arith.mulf %4, %12 : vector<1x128xf32>
    %14 = arith.addf %5, %13 : vector<1x128xf32>
    %c64_i32 = arith.constant 64 : i32
    %15 = tpu.dynamic_rotate %14 by %c64_i32 dim 1 : vector<1x128xf32>, i32 -> vector<1x128xf32>
    %16 = tpu.iota {dimensions = array<i32: 1>} : vector<1x128xi32>
    %c0_i32 = arith.constant 0 : i32
    %17 = vector.broadcast %c0_i32 : i32 to vector<1x128xi32>
    %18 = arith.cmpi eq, %16, %17 : vector<1x128xi32>
    %cst_10 = arith.constant 0.000000e+00 : f32
    %19 = vector.broadcast %cst_10 : f32 to vector<1x128xf32>
    %20 = arith.select %18, %14, %19 : vector<1x128xi1>, vector<1x128xf32>
    %cst_11 = arith.constant dense<0.000000e+00> : vector<1xf32>
    %21 = vector.multi_reduction <add>, %20, %cst_11 [1] : vector<1x128xf32> to vector<1xf32>
    %22 = vector.shape_cast %21 : vector<1xf32> to vector<1x1xf32>
    %cst_12 = arith.constant 0.000000e+00 : f32
    %23 = vector.broadcast %cst_12 : f32 to vector<1x128xf32>
    %24 = arith.select %18, %15, %23 : vector<1x128xi1>, vector<1x128xf32>
    %cst_13 = arith.constant dense<0.000000e+00> : vector<1xf32>
    %25 = vector.multi_reduction <add>, %24, %cst_13 [1] : vector<1x128xf32> to vector<1xf32>
    %26 = vector.shape_cast %25 : vector<1xf32> to vector<1x1xf32>
    %c0_14 = arith.constant 0 : index
    %c0_15 = arith.constant 0 : index
    %27 = vector.load %arg2[%c0_14, %c0_15] : memref<16x128xf32, #tpu.memory_space<vmem>>, vector<16x128xf32>
    %28 = vector.broadcast %22 : vector<1x1xf32> to vector<16x128xf32>
    %29 = arith.mulf %28, %27 : vector<16x128xf32>
    %30 = vector.broadcast %26 : vector<1x1xf32> to vector<16x128xf32>
    %31 = arith.addf %29, %30 : vector<16x128xf32>
    %c0_16 = arith.constant 0 : index
    %c0_17 = arith.constant 0 : index
    %32 = vector.load %arg6[%c0_16, %c0_17] : memref<16x128xf32, #tpu.memory_space<vmem>>, vector<16x128xf32>
    tpu.vector_store %arg6[%c0_16, %c0_17], %31 {strides = array<i32>} : memref<16x128xf32, #tpu.memory_space<vmem>>, vector<16x128xf32>,
    %c1_i32 = arith.constant 1 : i32
    %33 = vector.broadcast %c1_i32 : i32 to vector<1x128xi32>
    %34 = arith.cmpi eq, %16, %33 : vector<1x128xi32>
    %cst_18 = arith.constant 0.000000e+00 : f32
    %35 = vector.broadcast %cst_18 : f32 to vector<1x128xf32>
    %36 = arith.select %34, %14, %35 : vector<1x128xi1>, vector<1x128xf32>
    %cst_19 = arith.constant dense<0.000000e+00> : vector<1xf32>
    %37 = vector.multi_reduction <add>, %36, %cst_19 [1] : vector<1x128xf32> to vector<1xf32>
    %38 = vector.shape_cast %37 : vector<1xf32> to vector<1x1xf32>
    %cst_20 = arith.constant 0.000000e+00 : f32
    %39 = vector.broadcast %cst_20 : f32 to vector<1x128xf32>
    %40 = arith.select %34, %15, %39 : vector<1x128xi1>, vector<1x128xf32>
    %cst_21 = arith.constant dense<0.000000e+00> : vector<1xf32>
    %41 = vector.multi_reduction <add>, %40, %cst_21 [1] : vector<1x128xf32> to vector<1xf32>
    %42 = vector.shape_cast %41 : vector<1xf32> to vector<1x1xf32>
    %c0_22 = arith.constant 0 : index
    %c0_23 = arith.constant 0 : index
    %43 = vector.load %arg3[%c0_22, %c0_23] : memref<1x128xf32, #tpu.memory_space<vmem>>, vector<1x128xf32>
    %44 = vector.broadcast %38 : vector<1x1xf32> to vector<1x128xf32>
    %45 = arith.mulf %44, %43 : vector<1x128xf32>
    %46 = vector.broadcast %42 : vector<1x1xf32> to vector<1x128xf32>
    %47 = arith.addf %45, %46 : vector<1x128xf32>
    %c0_24 = arith.constant 0 : index
    %c0_25 = arith.constant 0 : index
    %48 = vector.load %arg7[%c0_24, %c0_25] : memref<1x128xf32, #tpu.memory_space<vmem>>, vector<1x128xf32>
    tpu.vector_store %arg7[%c0_24, %c0_25], %47 {strides = array<i32>} : memref<1x128xf32, #tpu.memory_space<vmem>>, vector<1x128xf32>,
    %c2_i32 = arith.constant 2 : i32
    %49 = vector.broadcast %c2_i32 : i32 to vector<1x128xi32>
    %50 = arith.cmpi eq, %16, %49 : vector<1x128xi32>
    %cst_26 = arith.constant 0.000000e+00 : f32
    %51 = vector.broadcast %cst_26 : f32 to vector<1x128xf32>
    %52 = arith.select %50, %14, %51 : vector<1x128xi1>, vector<1x128xf32>
    %cst_27 = arith.constant dense<0.000000e+00> : vector<1xf32>
    %53 = vector.multi_reduction <add>, %52, %cst_27 [1] : vector<1x128xf32> to vector<1xf32>
    %54 = vector.shape_cast %53 : vector<1xf32> to vector<1x1xf32>
    %cst_28 = arith.constant 0.000000e+00 : f32
    %55 = vector.broadcast %cst_28 : f32 to vector<1x128xf32>
    %56 = arith.select %50, %15, %55 : vector<1x128xi1>, vector<1x128xf32>
    %cst_29 = arith.constant dense<0.000000e+00> : vector<1xf32>
    %57 = vector.multi_reduction <add>, %56, %cst_29 [1] : vector<1x128xf32> to vector<1xf32>
    %58 = vector.shape_cast %57 : vector<1xf32> to vector<1x1xf32>
    %c0_30 = arith.constant 0 : index
    %c0_31 = arith.constant 0 : index
    %59 = vector.load %arg4[%c0_30, %c0_31] : memref<16x128xf32, #tpu.memory_space<vmem>>, vector<16x128xf32>
    %60 = vector.broadcast %54 : vector<1x1xf32> to vector<16x128xf32>
    %61 = arith.mulf %60, %59 : vector<16x128xf32>
    %62 = vector.broadcast %58 : vector<1x1xf32> to vector<16x128xf32>
    %63 = arith.addf %61, %62 : vector<16x128xf32>
    %c0_32 = arith.constant 0 : index
    %c0_33 = arith.constant 0 : index
    %64 = vector.load %arg8[%c0_32, %c0_33] : memref<16x128xf32, #tpu.memory_space<vmem>>, vector<16x128xf32>
    tpu.vector_store %arg8[%c0_32, %c0_33], %63 {strides = array<i32>} : memref<16x128xf32, #tpu.memory_space<vmem>>, vector<16x128xf32>,
    %c3_i32 = arith.constant 3 : i32
    %65 = vector.broadcast %c3_i32 : i32 to vector<1x128xi32>
    %66 = arith.cmpi eq, %16, %65 : vector<1x128xi32>
    %cst_34 = arith.constant 0.000000e+00 : f32
    %67 = vector.broadcast %cst_34 : f32 to vector<1x128xf32>
    %68 = arith.select %66, %14, %67 : vector<1x128xi1>, vector<1x128xf32>
    %cst_35 = arith.constant dense<0.000000e+00> : vector<1xf32>
    %69 = vector.multi_reduction <add>, %68, %cst_35 [1] : vector<1x128xf32> to vector<1xf32>
    %70 = vector.shape_cast %69 : vector<1xf32> to vector<1x1xf32>
    %cst_36 = arith.constant 0.000000e+00 : f32
    %71 = vector.broadcast %cst_36 : f32 to vector<1x128xf32>
    %72 = arith.select %66, %15, %71 : vector<1x128xi1>, vector<1x128xf32>
    %cst_37 = arith.constant dense<0.000000e+00> : vector<1xf32>
    %73 = vector.multi_reduction <add>, %72, %cst_37 [1] : vector<1x128xf32> to vector<1xf32>
    %74 = vector.shape_cast %73 : vector<1xf32> to vector<1x1xf32>
    %c0_38 = arith.constant 0 : index
    %c0_39 = arith.constant 0 : index
    %75 = vector.load %arg5[%c0_38, %c0_39] : memref<2x128xf32, #tpu.memory_space<vmem>>, vector<2x128xf32>
    %76 = vector.broadcast %70 : vector<1x1xf32> to vector<2x128xf32>
    %77 = arith.mulf %76, %75 : vector<2x128xf32>
    %78 = vector.broadcast %74 : vector<1x1xf32> to vector<2x128xf32>
    %79 = arith.addf %77, %78 : vector<2x128xf32>
    %c0_40 = arith.constant 0 : index
    %c0_41 = arith.constant 0 : index
    %80 = vector.load %arg9[%c0_40, %c0_41] : memref<2x128xf32, #tpu.memory_space<vmem>>, vector<2x128xf32>
    tpu.vector_store %arg9[%c0_40, %c0_41], %79 {strides = array<i32>} : memref<2x128xf32, #tpu.memory_space<vmem>>, vector<2x128xf32>,
    return
  }
}

</mosaic_0001>

<bundles_post_ra>
// kernel: _forward_core.1
= control target key start
LH: loop header
LB: loop body
LE: loop exit
PB: predicated region body
PF: predicated region fallthrough
CT: control target
= control target key end

     0   :  { %15 = vsyncpa [#allocation3], 0  ;;  %s449_s30 = smov [#allocation2]   ;;  %s571_s0 = inlined_call_operand.vmem [shape: f32[1,32], index: 0, kind: input, shape index: {}]   ;;  %s572_s1 = inlined_call_operand.hbm [shape: f32[168,128], index: 1, kind: input, shape index: {}]   ;;  %s573_s2 = inlined_call_operand.vmem [shape: f32[16,128], index: 2, kind: input, shape index: {}, may-alias: {2,6}]   ;;  %s574_s3 = inlined_call_operand.vmem [shape: f32[1,128], index: 3, kind: input, shape index: {}, may-alias: {3,7}]   ;;  %s575_s4 = inlined_call_operand.vmem [shape: f32[16,128], index: 4, kind: input, shape index: {}, may-alias: {4,8}]   ;;  %s576_s5 = inlined_call_operand.vmem [shape: f32[2,128], index: 5, kind: input, shape index: {}, may-alias: {5,9}]   ;;  %s577_s6 = inlined_call_operand.vmem [shape: f32[16,128], index: 6, kind: output, shape index: {0}, may-alias: {2,6}]   ;;  %s578_s7 = inlined_call_operand.vmem [shape: f32[1,128], index: 7, kind: output, shape index: {1}, may-alias: {3,7}]   ;;  %s579_s8 = inlined_call_operand.vmem [shape: f32[16,128], index: 8, kind: output, shape index: {2}, may-alias: {4,8}]   ;;  %s580_s9 = inlined_call_operand.vmem [shape: f32[2,128], index: 9, kind: output, shape index: {3}, may-alias: {5,9}]  }
   0x1   :  { %s23_s10 = sshll.u32 %s449_s30, 4  ;;  %s425_s13 = scalar_lea.hbm %s572_s1, 2688  ;;  %s24_s10 = int_to_ptr.vmem [resolvable:$true] %s23_s10 }
   0x2   :  { %p426_p0 = scmp.ne.s32.totalorder %s572_s1, %s425_s13  ;;  %p429_p1 = scmp.lt.u32.totalorder %s425_s13, %s572_s1 }
   0x4   :  { %p431_p2 = pnand %p429_p1, %p426_p0 }
   0x6   :  { %434 = shalt.err (!%p431_p2)
}
   0x7   :  { %s435_s18 = scalar_lea.vmem %s24_s10, 2688  ;;  %p440_p4 = scmp.lt.s32.totalorder %s24_s10, %s24_s10 }
   0x8   :  { %p436_p3 = scmp.ne.s32.totalorder %s24_s10, %s435_s18  ;;  %p441_p5 = scmp.lt.s32.totalorder %s435_s18, %s435_s18 }
   0xa   :  { %p442_p6 = por %p441_p5, %p440_p4 }
   0xc   :  { %p443_p7 = pnand %p442_p6, %p436_p3 }
   0xe   :  { %446 = shalt.err (!%p443_p7)
}
   0xf   :  { %s450_s19 = smov 128   ;;  %s451_s20 = smov 8  }
  0x10   :  { %29 = dma.hbm_to_vmem [thread:$0]  %s572_s1, 2688, %s24_s10, [#allocation3], %s450_s19, %s450_s19, %s451_s20  }
  0x11   :  { %447 = dma.done.wait [#allocation3], 2688  }
  0x12   :  { %448 = vsyncadd [#allocation3], 4294964608  ;;  %v452_v0 = vmov 0.0|0.0   ;;  %vm453_vm0 = vmmov 0   ;;  %v454_v1 = vmov 0.0   ;;  %v41_v2 = vld [vmem:[#allocation2] sm:$0xff]  ;;  %v215_v38 = vlaneseq }
  0x13   :  { %388 = vmatprep.subr.bf16.mxu0 %v452_v0  ;;  %350 = vmatprep.mubr.msk.f32.mxu0 %vm453_vm0, %v454_v1  ;;  %v42_v3 = vld [vmem:[#allocation2 + $0x8] sm:$0xff]  ;;  %v43_v4 = vld [vmem:[#allocation2 + $0x10] sm:$0xff]  ;;  %v44_v6 = vld [vmem:[#allocation2 + $0x18] sm:$0xff]  ;;  %vm66_vm1 = vcmask 261120   ;;  %vm219_vm3 = vcmask 1040384  }
  0x14   :  { %394 = vmatprep.subr.bf16.mxu1 %v452_v0  ;;  %385 = vmatprep.mubr.msk.f32.mxu1 %vm453_vm0, %v454_v1  ;;  %v389_v5 = vpack.c.bf16 %v42_v3, %v41_v2  ;;  %v45_v7 = vld [vmem:[#allocation2 + $0x20] sm:$0xff]  ;;  %v46_v8 = vld [vmem:[#allocation2 + $0x28] sm:$0xff]  ;;  %v47_v9 = vld [vmem:[#allocation2 + $0x30] sm:$0xff]  ;;  %v392_v11 = vpack.c.bf16 %v44_v6, %v43_v4  ;;  %v216_v42 = vand.u32 127, %v215_v38  ;;  %v230_v3 = vshrl.u32 %v215_v38, 7 }
  0x15   :  { %v48_v10 = vld [vmem:[#allocation2 + $0x38] sm:$0xff]  ;;  %v395_v12 = vpack.c.bf16 %v46_v8, %v45_v7  ;;  %v49_v14 = vld [vmem:[#allocation2 + $0x40] sm:$0xff]  ;;  %v50_v15 = vld [vmem:[#allocation2 + $0x48] sm:$0xff] }
  0x16   :  { %390 = vmatpush3.bf16.msra.mxu0 %v389_v5  ;;  %v398_v13 = vpack.c.bf16 %v48_v10, %v47_v9  ;;  %v65_v16 = vld [vmem:[%s571_s0] sm:$0x1]  ;;  %v401_v17 = vpack.c.bf16 %v50_v15, %v49_v14  ;;  %v51_v18 = vld [vmem:[#allocation2 + $0x50] sm:$0xff]  ;;  %v52_v19 = vld [vmem:[#allocation2 + $0x58] sm:$0xff]  ;;  %vm256_vm2 = vcmp.eq.s32.totalorder %v216_v42, 2  ;;  %vm281_vm4 = vcmp.eq.s32.totalorder %v216_v42, 3 }
  0x17   :  { %391 = vmatprep.subr.bf16.mxu0 %v452_v0  ;;  %396 = vmatpush3.bf16.msra.mxu1 %v395_v12  ;;  %v404_v20 = vpack.c.bf16 %v52_v19, %v51_v18  ;;  %v53_v21 = vld [vmem:[#allocation2 + $0x60] sm:$0xff]  ;;  %v54_v22 = vld [vmem:[#allocation2 + $0x68] sm:$0xff]  ;;  %v55_v24 = vld [vmem:[#allocation2 + $0x70] sm:$0xff]  ;;  %s455_s0 = smov 64   ;;  %vm243_vm5 = vcmp.eq.s32.totalorder %v216_v42, 1  ;;  %vm217_vm6 = vcmp.eq.s32.totalorder %v216_v42, 0 }
  0x18   :  { %397 = vmatprep.subr.bf16.mxu1 %v452_v0  ;;  %v407_v23 = vpack.c.bf16 %v54_v22, %v53_v21  ;;  %v56_v25 = vld [vmem:[#allocation2 + $0x78] sm:$0xff]  ;;  %v57_v27 = vld [vmem:[#allocation2 + $0x80] sm:$0xff]  ;;  %v58_v28 = vld [vmem:[#allocation2 + $0x88] sm:$0xff]  ;;  %v231_v5 = vsub.s32 0, %v230_v3 }
  0x19   :  { %v410_v26 = vpack.c.bf16 %v56_v25, %v55_v24  ;;  %v413_v29 = vpack.c.bf16 %v58_v28, %v57_v27  ;;  %v59_v30 = vld [vmem:[#allocation2 + $0x90] sm:$0xff]  ;;  %v60_v31 = vld [vmem:[#allocation2 + $0x98] sm:$0xff]  ;;  %v61_v33 = vld [vmem:[#allocation2 + $0xa0] sm:$0x1] }
  0x1a   :  { %393 = vmatpush3.bf16.msra.mxu0 %v392_v11  ;;  %v416_v32 = vpack.c.bf16 %v60_v31, %v59_v30  ;;  %v62_v39 = vld [vmem:[#allocation2 + $0xa1] sm:$0x1]  ;;  %v63_v40 = vld [vmem:[#allocation2 + $0xa2] sm:$0x1]  ;;  %v64_v45 = vld [vmem:[#allocation2 + $0xa3] sm:$0x1] }
  0x1b   :  { %399 = vmatpush3.bf16.msra.mxu1 %v398_v13  ;;  %v227_v8 = vld [vmem:[%s573_s2] sm:$0xff]  ;;  %v228_v9 = vld [vmem:[%s573_s2 + $0x8] sm:$0xff] }
  0x1c   :  { %400 = vmatprep.subr.bf16.mxu1 %v452_v0  ;;  %v265_v15 = vld [vmem:[%s575_s4] sm:$0xff] }
  0x1d   :  { %351 = vmatmul.mubr.msk.f32.vlgmr.msra.gmra.mrb[0].mxu0 %vm66_vm1, %v65_v16  ;;  %v266_v16 = vld [vmem:[%s575_s4 + $0x8] sm:$0xff]  ;;  %v290_v24 = vld [vmem:[%s576_s5] sm:$0x3] }
  0x1e   :  { %v252_v27 = vld [vmem:[%s574_s3] sm:$0x1] }
  0x1f   :  { %402 = vmatpush3.bf16.msra.mxu1 %v401_v17 }
  0x20   :  { %403 = vmatprep.subr.bf16.mxu1 %v452_v0 }
  0x23   :  { %405 = vmatpush3.bf16.msra.mxu1 %v404_v20 }
  0x24   :  { %406 = vmatprep.subr.bf16.mxu1 %v452_v0 }
  0x27   :  { %408 = vmatpush3.bf16.msra.mxu1 %v407_v23 }
  0x28   :  { %409 = vmatprep.subr.bf16.mxu1 %v452_v0 }
  0x2b   :  { %411 = vmatpush3.bf16.msra.mxu1 %v410_v26 }
  0x2c   :  { %412 = vmatprep.subr.bf16.mxu1 %v452_v0 }
  0x2f   :  { %414 = vmatpush3.bf16.msra.mxu1 %v413_v29 }
  0x30   :  { %415 = vmatprep.subr.bf16.mxu1 %v452_v0 }
  0x33   :  { %417 = vmatpush3.bf16.msra.mxu1 %v416_v32 }
  0xf0   :  { %v136_v34 = vpop.f32.mrb[0].mxu0 }
  0xf1   :  { %v137_v35 = vadd.f32 %v136_v34, %v61_v33  ;;  %v352_v36 = vpop.f32.mrb[1].mxu0 }
  0xf3   :  { %v140_v37 = vmax.f32 %v137_v35, 0.0 }
  0xf5   :  { %386 = vmatmul.mubr.f32.vlgmr.msra.gmra.mrb[0].mxu1 %v140_v37 }
 0x1c8   :  { %v207_v41 = vpop.f32.mrb[0].mxu1 }
 0x1c9   :  { %v208_v43 = vadd.f32 %v207_v41, %v62_v39  ;;  %v387_v44 = vpop.f32.mrb[1].mxu1 }
 0x1cb   :  { %v211_v46 = vmul.f32 %v208_v43, %v63_v40 }
 0x1cd   :  { %v212_v47 = vadd.f32 %v211_v46, %v64_v45 }
 0x1cf   :  { %213 = vrot.lane.b32.xlu0 %v212_v47, %s455_s0  ;;  %v257_v48 = vsel %vm256_vm2, %v212_v47, 0.0  ;;  %v282_v50 = vsel %vm281_vm4, %v212_v47, 0.0  ;;  %v244_v52 = vsel %vm243_vm5, %v212_v47, 0.0  ;;  %v218_v54 = vsel %vm217_vm6, %v212_v47, 0.0 }
 0x1d0   :  { %v258_v49 = vsel %vm219_vm3, %v257_v48, 0.0  ;;  %v283_v51 = vsel %vm219_vm3, %v282_v50, 0.0  ;;  %v245_v53 = vsel %vm219_vm3, %v244_v52, 0.0  ;;  %v220_v55 = vsel %vm219_vm3, %v218_v54, 0.0 }
 0x1d1   :  { %259 = vadd.xlane.f32.xlu1 %v258_v49 }
 0x1d5   :  { %284 = vadd.xlane.f32.xlu1 %v283_v51 }
 0x1d9   :  { %246 = vadd.xlane.f32.xlu1 %v245_v53 }
 0x1ee   :  { %221 = vadd.xlane.f32.xlu0 %v220_v55 }
 0x241   :  { %v214_v56 = vpop.permute.xlu0 %213 }
 0x242   :  { %v223_v57 = vsel %vm217_vm6, %v214_v56, 0.0  ;;  %v261_v59 = vsel %vm256_vm2, %v214_v56, 0.0  ;;  %v286_v61 = vsel %vm281_vm4, %v214_v56, 0.0  ;;  %v248_v63 = vsel %vm243_vm5, %v214_v56, 0.0 }
 0x243   :  { %v224_v58 = vsel %vm219_vm3, %v223_v57, 0.0  ;;  %v262_v60 = vsel %vm219_vm3, %v261_v59, 0.0  ;;  %v287_v62 = vsel %vm219_vm3, %v286_v61, 0.0  ;;  %v249_v0 = vsel %vm219_vm3, %v248_v63, 0.0 }
 0x244   :  { %225 = vadd.xlane.f32.xlu1 %v224_v58 }
 0x248   :  { %263 = vadd.xlane.f32.xlu1 %v262_v60 }
 0x24c   :  { %288 = vadd.xlane.f32.xlu1 %v287_v62 }
 0x250   :  { %250 = vadd.xlane.f32.xlu1 %v249_v0 }
 0x25e   :  { %v260_v1 = vpop.xlane.xlu1 %259 }
 0x25f   :  { %v270_v11 = vrot.slane %v260_v1, %v231_v5 }
 0x261   :  { %v271_v20 = vmul.f32 %v270_v11, %v265_v15  ;;  %v272_v21 = vmul.f32 %v270_v11, %v266_v16 }
 0x262   :  { %v285_v2 = vpop.xlane.xlu1 %284 }
 0x263   :  { %v294_v22 = vrot.slane %v285_v2, %v231_v5 }
 0x265   :  { %v295_v29 = vmul.f32 %v294_v22, %v290_v24 }
 0x266   :  { %v247_v6 = vpop.xlane.xlu1 %246 }
 0x267   :  { %v253_v31 = vmul.f32 %v252_v27, %v247_v6 }
 0x27b   :  { %v222_v4 = vpop.xlane.xlu0 %221 }
 0x27c   :  { %v232_v7 = vrot.slane %v222_v4, %v231_v5 }
 0x27e   :  { %v233_v12 = vmul.f32 %v232_v7, %v227_v8  ;;  %v234_v13 = vmul.f32 %v232_v7, %v228_v9 }
 0x2d1   :  { %v226_v10 = vpop.xlane.xlu1 %225 }
 0x2d2   :  { %v238_v14 = vrot.slane %v226_v10, %v231_v5 }
 0x2d4   :  { %v239_v17 = vadd.f32 %v238_v14, %v233_v12  ;;  %v240_v18 = vadd.f32 %v238_v14, %v234_v13 }
 0x2d5   :  { %v264_v19 = vpop.xlane.xlu1 %263 }
 0x2d6   :  { %241 = vst [vmem:[%s577_s6] sm:$0xff] %v239_v17  ;;  %242 = vst [vmem:[%s577_s6 + $0x8] sm:$0xff] %v240_v18  ;;  %v276_v23 = vrot.slane %v264_v19, %v231_v5 }
 0x2d8   :  { %v277_v25 = vadd.f32 %v276_v23, %v271_v20  ;;  %v278_v26 = vadd.f32 %v276_v23, %v272_v21 }
 0x2d9   :  { %v289_v28 = vpop.xlane.xlu1 %288 }
 0x2da   :  { %279 = vst [vmem:[%s579_s8] sm:$0xff] %v277_v25  ;;  %280 = vst [vmem:[%s579_s8 + $0x8] sm:$0xff] %v278_v26  ;;  %v299_v30 = vrot.slane %v289_v28, %v231_v5 }
 0x2dc   :  { %v300_v32 = vadd.f32 %v299_v30, %v295_v29 }
 0x2dd   :  { %v251_v33 = vpop.xlane.xlu1 %250 }
 0x2de   :  { %301 = vst [vmem:[%s580_s9] sm:$0x3] %v300_v32  ;;  %v254_v34 = vadd.f32 %v253_v31, %v251_v33 }
 0x2e0   :  { %255 = vst [vmem:[%s578_s7] sm:$0x1] %v254_v34 }
 0x2e1   :  { %318 = vsyncpa [#allocation3], 1 }

</bundles_post_ra>
